<compile_context>
chip_gen: v6e
topology: v6e:2x2x1
jax: 0.10.0
libtpu: 0.0.40
codegen_flags: <defaults>
</compile_context>

<pallas_src>
import jax
import jax.numpy as jnp
from jax.experimental import pallas as pl
from jax.experimental.pallas import tpu as pltpu

HIDDEN_DIM = 50          # logical hidden width (PyTorch default)
IN_DIM = 4               # flattened input features
OUT_DIM = 2              # logical output width
PAD_DIM = 128            # lane-aligned padded width for hidden layers
OUT_PAD = 8              # lanes actually written for the output (>= OUT_DIM)
NUM_HIDDEN = 7           # number of H->H layers (layers 2..8)
TILE_B = 2048            # max batch rows per grid step


def _round_up(n, m):
    return ((n + m - 1) // m) * m


def mlp_kernel(x_ref, w1_ref, b1_ref, wh_ref, bh_ref, w9_ref, b9_ref, o_ref):
    # x_ref: (tile_b, 4) f32 activations (pipelined over the batch grid).
    # wh/w9 are bf16 (MXU operands); b*, w1 are f32. All lane-padded to 128.
    x = x_ref[...]

    # ---- Layer 1: Linear(4, 128pad) on the VPU (K=4 would waste the MXU) ----
    acc = x[:, 0:1] * w1_ref[0:1, :]
    acc = acc + x[:, 1:2] * w1_ref[1:2, :]
    acc = acc + x[:, 2:3] * w1_ref[2:3, :]
    acc = acc + x[:, 3:4] * w1_ref[3:4, :]
    h = jnp.tanh(acc + b1_ref[...])

    # ---- Layers 2..8: bf16 MXU matmul, f32 accumulation, f32 bias + tanh ----
    for i in range(NUM_HIDDEN):
        y = jnp.dot(h.astype(jnp.bfloat16), wh_ref[i],
                    preferred_element_type=jnp.float32) + bh_ref[i]
        h = jnp.tanh(y)

    # ---- Layer 9: Linear(128pad, 128pad); only the first OUT_PAD lanes are stored ----
    y = jnp.dot(h.astype(jnp.bfloat16), w9_ref[...],
                preferred_element_type=jnp.float32) + b9_ref[...]
    o_ref[...] = y[:, :OUT_PAD]


def nine_layer_tanh_forward(x, padded_params):
    w1, b1, wh, bh, w9, b9 = padded_params
    batch = x.shape[0]
    x2d = x.reshape(batch, -1).astype(jnp.float32)   # nn.Flatten()
    assert x2d.shape[1] == IN_DIM

    # Pick the batch tile: as large as possible (amortize per-step overhead), but if
    # the batch is big enough to split, guarantee >= 2 grid steps for v7x megacore.
    batch8 = _round_up(batch, 8)
    if batch8 >= 16:
        tile_b = min(TILE_B, _round_up(pl.cdiv(batch8, 2), 8))
    else:
        tile_b = batch8
    batch_p = _round_up(batch8, tile_b)
    if batch_p != batch:
        x2d = jnp.pad(x2d, ((0, batch_p - batch), (0, 0)))

    const2 = lambda i: (0, 0)
    const3 = lambda i: (0, 0, 0)

    out = pl.pallas_call(
        mlp_kernel,
        out_shape=jax.ShapeDtypeStruct((batch_p, OUT_PAD), jnp.float32),
        grid=(batch_p // tile_b,),
        in_specs=[
            pl.BlockSpec((tile_b, IN_DIM), lambda i: (i, 0)),          # x (pipelined)
            pl.BlockSpec((IN_DIM, PAD_DIM), const2),                   # w1 (resident)
            pl.BlockSpec((1, PAD_DIM), const2),                        # b1
            pl.BlockSpec((NUM_HIDDEN, PAD_DIM, PAD_DIM), const3),      # w2..w8 (bf16)
            pl.BlockSpec((NUM_HIDDEN, 1, PAD_DIM), const3),            # b2..b8
            pl.BlockSpec((PAD_DIM, PAD_DIM), const2),                  # w9 (bf16)
            pl.BlockSpec((1, PAD_DIM), const2),                        # b9
        ],
        out_specs=pl.BlockSpec((tile_b, OUT_PAD), lambda i: (i, 0)),   # narrow output
        compiler_params=pltpu.CompilerParams(
            dimension_semantics=("parallel",),
            vmem_limit_bytes=32 * 1024 * 1024,
        ),
    )(x2d, w1, b1, wh, bh, w9, b9)

    return out[:batch, :OUT_DIM]


# ---------------------------- parameter handling ----------------------------

def xavier_uniform(key, fan_in, fan_out):
    # torch.nn.init.xavier_uniform_ (gain=1): U(-a, a), a = sqrt(6/(fan_in+fan_out)).
    bound = jnp.sqrt(6.0 / (fan_in + fan_out))
    # PyTorch weight shape is (out, in); sample that shape then transpose to (in, out).
    w = jax.random.uniform(
        key, (fan_out, fan_in), dtype=jnp.float32, minval=-bound, maxval=bound
    )
    return w.T


def init_params(key, hidden_dim=HIDDEN_DIM):
    """Logical (unpadded) parameters: list of (W_in_out, b) for the 9 layers."""
    keys = jax.random.split(key, 9)
    dims = [IN_DIM] + [hidden_dim] * 8 + [OUT_DIM]
    params = []
    for li in range(9):
        w = xavier_uniform(keys[li], dims[li], dims[li + 1])
        b = jnp.full((1, dims[li + 1]), 0.01, dtype=jnp.float32)
        params.append((w, b))
    return params


def pad_params(params, hidden_dim=HIDDEN_DIM):
    """Zero-pad weights/biases once to lane-aligned tiles; MXU operands -> bf16."""
    (w1, b1) = params[0]
    (w9, b9) = params[8]

    w1_p = jnp.zeros((IN_DIM, PAD_DIM), jnp.float32).at[:, :hidden_dim].set(w1)
    b1_p = jnp.zeros((1, PAD_DIM), jnp.float32).at[:, :hidden_dim].set(b1)

    wh_p = jnp.zeros((NUM_HIDDEN, PAD_DIM, PAD_DIM), jnp.float32)
    bh_p = jnp.zeros((NUM_HIDDEN, 1, PAD_DIM), jnp.float32)
    for i in range(NUM_HIDDEN):
        w, b = params[1 + i]
        wh_p = wh_p.at[i, :hidden_dim, :hidden_dim].set(w)
        bh_p = bh_p.at[i, :, :hidden_dim].set(b)

    w9_p = jnp.zeros((PAD_DIM, PAD_DIM), jnp.float32).at[:hidden_dim, :OUT_DIM].set(w9)
    b9_p = jnp.zeros((1, PAD_DIM), jnp.float32).at[:, :OUT_DIM].set(b9)

    return (
        w1_p, b1_p,
        wh_p.astype(jnp.bfloat16), bh_p,
        w9_p.astype(jnp.bfloat16), b9_p,
    )


# ------------------------------- references ---------------------------------

def reference_forward_f32(x, params):
    h = x.reshape(x.shape[0], -1).astype(jnp.float32)
    for li, (w, b) in enumerate(params):
        h = h @ w + b
        if li < 8:
            h = jnp.tanh(h)
    return h


def reference_forward_bf16(x, params):
    """Mirrors the kernel's numerics: f32 layer 1, bf16 matmul operands afterwards."""
    h = x.reshape(x.shape[0], -1).astype(jnp.float32)
    w, b = params[0]
    h = jnp.tanh(h @ w + b)
    for li in range(1, 9):
        w, b = params[li]
        y = jnp.dot(h.astype(jnp.bfloat16), w.astype(jnp.bfloat16),
                    preferred_element_type=jnp.float32) + b
        h = jnp.tanh(y) if li < 8 else y
    return h


if __name__ == "__main__":
    key = jax.random.PRNGKey(0)
    kx, kp = jax.random.split(key)

    # Small input consistent with Flatten -> Linear(4, H): non-batch dims multiply to 4.
    batch = 8
    x = jax.random.normal(kx, (batch, 2, 2), dtype=jnp.float32)

    params = init_params(kp, hidden_dim=HIDDEN_DIM)
    padded = pad_params(params, hidden_dim=HIDDEN_DIM)

    out = nine_layer_tanh_forward(x, padded)
    out = jax.block_until_ready(out)
    assert out.shape == (batch, OUT_DIM)

    # Tight check against a reference with identical bf16-operand numerics.
    ref_bf16 = reference_forward_bf16(x, params)
    assert jnp.allclose(out, ref_bf16, atol=1e-2, rtol=1e-2), "mismatch vs bf16 reference"

    # Loose check against the pure-f32 PyTorch-equivalent forward.
    ref_f32 = reference_forward_f32(x, params)
    assert jnp.allclose(out, ref_f32, atol=5e-2, rtol=5e-2), "mismatch vs f32 reference"

    print("KERNEL_OK")
</pallas_src>

<mosaic_0001>
module attributes {stable_mosaic.version = 11 : i64} {
  func.func @mlp_kernel(%arg0: i32, %arg1: memref<8x4xf32, #tpu.memory_space<vmem>>, %arg2: memref<4x128xf32, #tpu.memory_space<vmem>>, %arg3: memref<1x128xf32, #tpu.memory_space<vmem>>, %arg4: memref<7x128x128xbf16, #tpu.memory_space<vmem>>, %arg5: memref<7x1x128xf32, #tpu.memory_space<vmem>>, %arg6: memref<128x128xbf16, #tpu.memory_space<vmem>>, %arg7: memref<1x128xf32, #tpu.memory_space<vmem>>, %arg8: memref<8x8xf32, #tpu.memory_space<vmem>>) attributes {dimension_semantics = [#tpu.dimension_semantics<parallel>], iteration_bounds = array<i64: 1>, scalar_prefetch = 0 : i64, scratch_operands = 0 : i64, tpu.core_type = #tpu.core_type<tc>, window_params = [{transform_indices = @transform_0, window_bounds = array<i64: 8, 4>}, {pipeline_mode = #tpu.pipeline_mode<synchronous>, transform_indices = @transform_1, window_bounds = array<i64: 4, 128>}, {pipeline_mode = #tpu.pipeline_mode<synchronous>, transform_indices = @transform_2, window_bounds = array<i64: 1, 128>}, {pipeline_mode = #tpu.pipeline_mode<synchronous>, transform_indices = @transform_3, window_bounds = array<i64: 7, 128, 128>}, {pipeline_mode = #tpu.pipeline_mode<synchronous>, transform_indices = @transform_4, window_bounds = array<i64: 7, 1, 128>}, {pipeline_mode = #tpu.pipeline_mode<synchronous>, transform_indices = @transform_5, window_bounds = array<i64: 128, 128>}, {pipeline_mode = #tpu.pipeline_mode<synchronous>, transform_indices = @transform_6, window_bounds = array<i64: 1, 128>}, {transform_indices = @transform_7, window_bounds = array<i64: 8, 8>}]} {
    %c0 = arith.constant 0 : index
    %c0_0 = arith.constant 0 : index
    %0 = vector.load %arg1[%c0, %c0_0] : memref<8x4xf32, #tpu.memory_space<vmem>>, vector<8x4xf32>
    %1 = vector.extract_strided_slice %0 {offsets = [0, 0], sizes = [8, 1], strides = [1, 1]} : vector<8x4xf32> to vector<8x1xf32>
    %c0_1 = arith.constant 0 : index
    %c0_2 = arith.constant 0 : index
    %2 = vector.load %arg2[%c0_1, %c0_2] : memref<4x128xf32, #tpu.memory_space<vmem>>, vector<1x128xf32>
    %3 = vector.broadcast %1 : vector<8x1xf32> to vector<8x128xf32>
    %4 = vector.broadcast %2 : vector<1x128xf32> to vector<8x128xf32>
    %5 = arith.mulf %3, %4 : vector<8x128xf32>
    %6 = vector.extract_strided_slice %0 {offsets = [0, 1], sizes = [8, 1], strides = [1, 1]} : vector<8x4xf32> to vector<8x1xf32>
    %c1 = arith.constant 1 : index
    %c0_3 = arith.constant 0 : index
    %7 = vector.load %arg2[%c1, %c0_3] : memref<4x128xf32, #tpu.memory_space<vmem>>, vector<1x128xf32>
    %8 = vector.broadcast %6 : vector<8x1xf32> to vector<8x128xf32>
    %9 = vector.broadcast %7 : vector<1x128xf32> to vector<8x128xf32>
    %10 = arith.mulf %8, %9 : vector<8x128xf32>
    %11 = arith.addf %5, %10 : vector<8x128xf32>
    %12 = vector.extract_strided_slice %0 {offsets = [0, 2], sizes = [8, 1], strides = [1, 1]} : vector<8x4xf32> to vector<8x1xf32>
    %c2 = arith.constant 2 : index
    %c0_4 = arith.constant 0 : index
    %13 = vector.load %arg2[%c2, %c0_4] : memref<4x128xf32, #tpu.memory_space<vmem>>, vector<1x128xf32>
    %14 = vector.broadcast %12 : vector<8x1xf32> to vector<8x128xf32>
    %15 = vector.broadcast %13 : vector<1x128xf32> to vector<8x128xf32>
    %16 = arith.mulf %14, %15 : vector<8x128xf32>
    %17 = arith.addf %11, %16 : vector<8x128xf32>
    %18 = vector.extract_strided_slice %0 {offsets = [0, 3], sizes = [8, 1], strides = [1, 1]} : vector<8x4xf32> to vector<8x1xf32>
    %c3 = arith.constant 3 : index
    %c0_5 = arith.constant 0 : index
    %19 = vector.load %arg2[%c3, %c0_5] : memref<4x128xf32, #tpu.memory_space<vmem>>, vector<1x128xf32>
    %20 = vector.broadcast %18 : vector<8x1xf32> to vector<8x128xf32>
    %21 = vector.broadcast %19 : vector<1x128xf32> to vector<8x128xf32>
    %22 = arith.mulf %20, %21 : vector<8x128xf32>
    %23 = arith.addf %17, %22 : vector<8x128xf32>
    %c0_6 = arith.constant 0 : index
    %c0_7 = arith.constant 0 : index
    %24 = vector.load %arg3[%c0_6, %c0_7] : memref<1x128xf32, #tpu.memory_space<vmem>>, vector<1x128xf32>
    %25 = vector.broadcast %24 : vector<1x128xf32> to vector<8x128xf32>
    %26 = arith.addf %23, %25 : vector<8x128xf32>
    %27 = math.tanh %26 : vector<8x128xf32>
    %28 = arith.truncf %27 : vector<8x128xf32> to vector<8x128xbf16>
    %c0_8 = arith.constant 0 : index
    %c0_9 = arith.constant 0 : index
    %c0_10 = arith.constant 0 : index
    %29 = vector.load %arg4[%c0_8, %c0_9, %c0_10] : memref<7x128x128xbf16, #tpu.memory_space<vmem>>, vector<1x128x128xbf16>
    %30 = vector.shape_cast %29 : vector<1x128x128xbf16> to vector<128x128xbf16>
    %cst = arith.constant dense<0.000000e+00> : vector<8x128xf32>
    %31 = tpu.matmul %28, %30, %cst {dimension_numbers = #tpu.dot_dimension_numbers<[1], [0], [0], [1], [0, 0, 1, 1], [], []>} : vector<8x128xbf16>, vector<128x128xbf16>, vector<8x128xf32> -> vector<8x128xf32>
    %c0_11 = arith.constant 0 : index
    %c0_12 = arith.constant 0 : index
    %c0_13 = arith.constant 0 : index
    %32 = vector.load %arg5[%c0_11, %c0_12, %c0_13] : memref<7x1x128xf32, #tpu.memory_space<vmem>>, vector<1x1x128xf32>
    %33 = vector.shape_cast %32 : vector<1x1x128xf32> to vector<1x128xf32>
    %34 = vector.broadcast %33 : vector<1x128xf32> to vector<8x128xf32>
    %35 = arith.addf %31, %34 : vector<8x128xf32>
    %36 = math.tanh %35 : vector<8x128xf32>
    %37 = arith.truncf %36 : vector<8x128xf32> to vector<8x128xbf16>
    %c1_14 = arith.constant 1 : index
    %c0_15 = arith.constant 0 : index
    %c0_16 = arith.constant 0 : index
    %38 = vector.load %arg4[%c1_14, %c0_15, %c0_16] : memref<7x128x128xbf16, #tpu.memory_space<vmem>>, vector<1x128x128xbf16>
    %39 = vector.shape_cast %38 : vector<1x128x128xbf16> to vector<128x128xbf16>
    %cst_17 = arith.constant dense<0.000000e+00> : vector<8x128xf32>
    %40 = tpu.matmul %37, %39, %cst_17 {dimension_numbers = #tpu.dot_dimension_numbers<[1], [0], [0], [1], [0, 0, 1, 1], [], []>} : vector<8x128xbf16>, vector<128x128xbf16>, vector<8x128xf32> -> vector<8x128xf32>
    %c1_18 = arith.constant 1 : index
    %c0_19 = arith.constant 0 : index
    %c0_20 = arith.constant 0 : index
    %41 = vector.load %arg5[%c1_18, %c0_19, %c0_20] : memref<7x1x128xf32, #tpu.memory_space<vmem>>, vector<1x1x128xf32>
    %42 = vector.shape_cast %41 : vector<1x1x128xf32> to vector<1x128xf32>
    %43 = vector.broadcast %42 : vector<1x128xf32> to vector<8x128xf32>
    %44 = arith.addf %40, %43 : vector<8x128xf32>
    %45 = math.tanh %44 : vector<8x128xf32>
    %46 = arith.truncf %45 : vector<8x128xf32> to vector<8x128xbf16>
    %c2_21 = arith.constant 2 : index
    %c0_22 = arith.constant 0 : index
    %c0_23 = arith.constant 0 : index
    %47 = vector.load %arg4[%c2_21, %c0_22, %c0_23] : memref<7x128x128xbf16, #tpu.memory_space<vmem>>, vector<1x128x128xbf16>
    %48 = vector.shape_cast %47 : vector<1x128x128xbf16> to vector<128x128xbf16>
    %cst_24 = arith.constant dense<0.000000e+00> : vector<8x128xf32>
    %49 = tpu.matmul %46, %48, %cst_24 {dimension_numbers = #tpu.dot_dimension_numbers<[1], [0], [0], [1], [0, 0, 1, 1], [], []>} : vector<8x128xbf16>, vector<128x128xbf16>, vector<8x128xf32> -> vector<8x128xf32>
    %c2_25 = arith.constant 2 : index
    %c0_26 = arith.constant 0 : index
    %c0_27 = arith.constant 0 : index
    %50 = vector.load %arg5[%c2_25, %c0_26, %c0_27] : memref<7x1x128xf32, #tpu.memory_space<vmem>>, vector<1x1x128xf32>
    %51 = vector.shape_cast %50 : vector<1x1x128xf32> to vector<1x128xf32>
    %52 = vector.broadcast %51 : vector<1x128xf32> to vector<8x128xf32>
    %53 = arith.addf %49, %52 : vector<8x128xf32>
    %54 = math.tanh %53 : vector<8x128xf32>
    %55 = arith.truncf %54 : vector<8x128xf32> to vector<8x128xbf16>
    %c3_28 = arith.constant 3 : index
    %c0_29 = arith.constant 0 : index
    %c0_30 = arith.constant 0 : index
    %56 = vector.load %arg4[%c3_28, %c0_29, %c0_30] : memref<7x128x128xbf16, #tpu.memory_space<vmem>>, vector<1x128x128xbf16>
    %57 = vector.shape_cast %56 : vector<1x128x128xbf16> to vector<128x128xbf16>
    %cst_31 = arith.constant dense<0.000000e+00> : vector<8x128xf32>
    %58 = tpu.matmul %55, %57, %cst_31 {dimension_numbers = #tpu.dot_dimension_numbers<[1], [0], [0], [1], [0, 0, 1, 1], [], []>} : vector<8x128xbf16>, vector<128x128xbf16>, vector<8x128xf32> -> vector<8x128xf32>
    %c3_32 = arith.constant 3 : index
    %c0_33 = arith.constant 0 : index
    %c0_34 = arith.constant 0 : index
    %59 = vector.load %arg5[%c3_32, %c0_33, %c0_34] : memref<7x1x128xf32, #tpu.memory_space<vmem>>, vector<1x1x128xf32>
    %60 = vector.shape_cast %59 : vector<1x1x128xf32> to vector<1x128xf32>
    %61 = vector.broadcast %60 : vector<1x128xf32> to vector<8x128xf32>
    %62 = arith.addf %58, %61 : vector<8x128xf32>
    %63 = math.tanh %62 : vector<8x128xf32>
    %64 = arith.truncf %63 : vector<8x128xf32> to vector<8x128xbf16>
    %c4 = arith.constant 4 : index
    %c0_35 = arith.constant 0 : index
    %c0_36 = arith.constant 0 : index
    %65 = vector.load %arg4[%c4, %c0_35, %c0_36] : memref<7x128x128xbf16, #tpu.memory_space<vmem>>, vector<1x128x128xbf16>
    %66 = vector.shape_cast %65 : vector<1x128x128xbf16> to vector<128x128xbf16>
    %cst_37 = arith.constant dense<0.000000e+00> : vector<8x128xf32>
    %67 = tpu.matmul %64, %66, %cst_37 {dimension_numbers = #tpu.dot_dimension_numbers<[1], [0], [0], [1], [0, 0, 1, 1], [], []>} : vector<8x128xbf16>, vector<128x128xbf16>, vector<8x128xf32> -> vector<8x128xf32>
    %c4_38 = arith.constant 4 : index
    %c0_39 = arith.constant 0 : index
    %c0_40 = arith.constant 0 : index
    %68 = vector.load %arg5[%c4_38, %c0_39, %c0_40] : memref<7x1x128xf32, #tpu.memory_space<vmem>>, vector<1x1x128xf32>
    %69 = vector.shape_cast %68 : vector<1x1x128xf32> to vector<1x128xf32>
    %70 = vector.broadcast %69 : vector<1x128xf32> to vector<8x128xf32>
    %71 = arith.addf %67, %70 : vector<8x128xf32>
    %72 = math.tanh %71 : vector<8x128xf32>
    %73 = arith.truncf %72 : vector<8x128xf32> to vector<8x128xbf16>
    %c5 = arith.constant 5 : index
    %c0_41 = arith.constant 0 : index
    %c0_42 = arith.constant 0 : index
    %74 = vector.load %arg4[%c5, %c0_41, %c0_42] : memref<7x128x128xbf16, #tpu.memory_space<vmem>>, vector<1x128x128xbf16>
    %75 = vector.shape_cast %74 : vector<1x128x128xbf16> to vector<128x128xbf16>
    %cst_43 = arith.constant dense<0.000000e+00> : vector<8x128xf32>
    %76 = tpu.matmul %73, %75, %cst_43 {dimension_numbers = #tpu.dot_dimension_numbers<[1], [0], [0], [1], [0, 0, 1, 1], [], []>} : vector<8x128xbf16>, vector<128x128xbf16>, vector<8x128xf32> -> vector<8x128xf32>
    %c5_44 = arith.constant 5 : index
    %c0_45 = arith.constant 0 : index
    %c0_46 = arith.constant 0 : index
    %77 = vector.load %arg5[%c5_44, %c0_45, %c0_46] : memref<7x1x128xf32, #tpu.memory_space<vmem>>, vector<1x1x128xf32>
    %78 = vector.shape_cast %77 : vector<1x1x128xf32> to vector<1x128xf32>
    %79 = vector.broadcast %78 : vector<1x128xf32> to vector<8x128xf32>
    %80 = arith.addf %76, %79 : vector<8x128xf32>
    %81 = math.tanh %80 : vector<8x128xf32>
    %82 = arith.truncf %81 : vector<8x128xf32> to vector<8x128xbf16>
    %c6 = arith.constant 6 : index
    %c0_47 = arith.constant 0 : index
    %c0_48 = arith.constant 0 : index
    %83 = vector.load %arg4[%c6, %c0_47, %c0_48] : memref<7x128x128xbf16, #tpu.memory_space<vmem>>, vector<1x128x128xbf16>
    %84 = vector.shape_cast %83 : vector<1x128x128xbf16> to vector<128x128xbf16>
    %cst_49 = arith.constant dense<0.000000e+00> : vector<8x128xf32>
    %85 = tpu.matmul %82, %84, %cst_49 {dimension_numbers = #tpu.dot_dimension_numbers<[1], [0], [0], [1], [0, 0, 1, 1], [], []>} : vector<8x128xbf16>, vector<128x128xbf16>, vector<8x128xf32> -> vector<8x128xf32>
    %c6_50 = arith.constant 6 : index
    %c0_51 = arith.constant 0 : index
    %c0_52 = arith.constant 0 : index
    %86 = vector.load %arg5[%c6_50, %c0_51, %c0_52] : memref<7x1x128xf32, #tpu.memory_space<vmem>>, vector<1x1x128xf32>
    %87 = vector.shape_cast %86 : vector<1x1x128xf32> to vector<1x128xf32>
    %88 = vector.broadcast %87 : vector<1x128xf32> to vector<8x128xf32>
    %89 = arith.addf %85, %88 : vector<8x128xf32>
    %90 = math.tanh %89 : vector<8x128xf32>
    %91 = arith.truncf %90 : vector<8x128xf32> to vector<8x128xbf16>
    %c0_53 = arith.constant 0 : index
    %c0_54 = arith.constant 0 : index
    %92 = vector.load %arg6[%c0_53, %c0_54] : memref<128x128xbf16, #tpu.memory_space<vmem>>, vector<128x128xbf16>
    %cst_55 = arith.constant dense<0.000000e+00> : vector<8x128xf32>
    %93 = tpu.matmul %91, %92, %cst_55 {dimension_numbers = #tpu.dot_dimension_numbers<[1], [0], [0], [1], [0, 0, 1, 1], [], []>} : vector<8x128xbf16>, vector<128x128xbf16>, vector<8x128xf32> -> vector<8x128xf32>
    %c0_56 = arith.constant 0 : index
    %c0_57 = arith.constant 0 : index
    %94 = vector.load %arg7[%c0_56, %c0_57] : memref<1x128xf32, #tpu.memory_space<vmem>>, vector<1x128xf32>
    %95 = vector.broadcast %94 : vector<1x128xf32> to vector<8x128xf32>
    %96 = arith.addf %93, %95 : vector<8x128xf32>
    %97 = vector.extract_strided_slice %96 {offsets = [0, 0], sizes = [8, 8], strides = [1, 1]} : vector<8x128xf32> to vector<8x8xf32>
    %c0_58 = arith.constant 0 : index
    %c0_59 = arith.constant 0 : index
    %98 = vector.load %arg8[%c0_58, %c0_59] : memref<8x8xf32, #tpu.memory_space<vmem>>, vector<8x8xf32>
    tpu.vector_store %arg8[%c0_58, %c0_59], %97 {strides = array<i32>} : memref<8x8xf32, #tpu.memory_space<vmem>>, vector<8x8xf32>,
    return
  }
  func.func @transform_0(%arg0: i32) -> (i32, i32) {
    %c0_i32 = arith.constant 0 : i32
    %c0_i32_0 = arith.constant 0 : i32
    return %arg0, %c0_i32 : i32, i32
  }
  func.func @transform_1(%arg0: i32) -> (i32, i32) {
    %c0_i32 = arith.constant 0 : i32
    %c0_i32_0 = arith.constant 0 : i32
    %c0_i32_1 = arith.constant 0 : i32
    return %c0_i32, %c0_i32_0 : i32, i32
  }
  func.func @transform_2(%arg0: i32) -> (i32, i32) {
    %c0_i32 = arith.constant 0 : i32
    %c0_i32_0 = arith.constant 0 : i32
    %c0_i32_1 = arith.constant 0 : i32
    return %c0_i32, %c0_i32_0 : i32, i32
  }
  func.func @transform_3(%arg0: i32) -> (i32, i32, i32) {
    %c0_i32 = arith.constant 0 : i32
    %c0_i32_0 = arith.constant 0 : i32
    %c0_i32_1 = arith.constant 0 : i32
    %c0_i32_2 = arith.constant 0 : i32
    return %c0_i32, %c0_i32_0, %c0_i32_1 : i32, i32, i32
  }
  func.func @transform_4(%arg0: i32) -> (i32, i32, i32) {
    %c0_i32 = arith.constant 0 : i32
    %c0_i32_0 = arith.constant 0 : i32
    %c0_i32_1 = arith.constant 0 : i32
    %c0_i32_2 = arith.constant 0 : i32
    return %c0_i32, %c0_i32_0, %c0_i32_1 : i32, i32, i32
  }
  func.func @transform_5(%arg0: i32) -> (i32, i32) {
    %c0_i32 = arith.constant 0 : i32
    %c0_i32_0 = arith.constant 0 : i32
    %c0_i32_1 = arith.constant 0 : i32
    return %c0_i32, %c0_i32_0 : i32, i32
  }
  func.func @transform_6(%arg0: i32) -> (i32, i32) {
    %c0_i32 = arith.constant 0 : i32
    %c0_i32_0 = arith.constant 0 : i32
    %c0_i32_1 = arith.constant 0 : i32
    return %c0_i32, %c0_i32_0 : i32, i32
  }
  func.func @transform_7(%arg0: i32) -> (i32, i32) {
    %c0_i32 = arith.constant 0 : i32
    %c0_i32_0 = arith.constant 0 : i32
    return %arg0, %c0_i32 : i32, i32
  }
}

</mosaic_0001>

<bundles_post_ra>
// kernel: tpu_custom_call.1
= control target key start
LH: loop header
LB: loop body
LE: loop exit
PB: predicated region body
PF: predicated region fallthrough
CT: control target
= control target key end

     0   :  { %12 = vsyncpa [#allocation3], 0  ;;  %s1702_s0 = inlined_call_operand.vmem [shape: f32[8,4], index: 0, kind: input, shape index: {}]   ;;  %s1703_s1 = inlined_call_operand.vmem [shape: f32[4,128], index: 1, kind: input, shape index: {}]   ;;  %s1704_s2 = inlined_call_operand.vmem [shape: f32[1,128], index: 2, kind: input, shape index: {}]   ;;  %s1705_s3 = inlined_call_operand.hbm [shape: bf16[7,128,128], index: 3, kind: input, shape index: {}]   ;;  %s1706_s4 = inlined_call_operand.vmem [shape: f32[7,1,128], index: 4, kind: input, shape index: {}]   ;;  %s1707_s5 = inlined_call_operand.hbm [shape: bf16[128,128], index: 5, kind: input, shape index: {}]   ;;  %s1708_s6 = inlined_call_operand.vmem [shape: f32[1,128], index: 6, kind: input, shape index: {}]   ;;  %s1709_s7 = inlined_call_operand.hbm [shape: f32[8,8], index: 7, kind: output, shape index: {}]  }
   0x1   :  { %13 = vsyncpa [#allocation6], 0 }
   0x2   :  { %14 = vsyncpa [#allocation4], 0  ;;  %s1520_s24 = smov [#allocation2]  }
   0x3   :  { %s26_s25 = sshll.u32 %s1520_s24, 4  ;;  %s27_s25 = int_to_ptr.vmem [resolvable:$true] %s26_s25 }
   0x4   :  { %s1462_s26 = scalar_lea.vmem %s27_s25, 7168  ;;  %p1467_p1 = scmp.lt.s32.totalorder %s27_s25, %s27_s25 }
   0x5   :  { %p1463_p0 = scmp.ne.s32.totalorder %s27_s25, %s1462_s26  ;;  %p1468_p2 = scmp.lt.s32.totalorder %s1462_s26, %s1462_s26 }
   0x7   :  { %p1469_p3 = por %p1468_p2, %p1467_p1 }
   0x9   :  { %p1470_p4 = pnand %p1469_p3, %p1463_p0 }
   0xb   :  { %1473 = shalt.err (!%p1470_p4)
}
   0xc   :  { %s1521_s27 = smov 64   ;;  %s1522_s28 = smov 4  }
   0xd   :  { %32 = dma.hbm_to_vmem [thread:$0]  %s1705_s3, 7168, %s27_s25, [#allocation3], %s1521_s27, %s1521_s27, %s1522_s28  }
   0xe   :  { %s1523_s8 = smov [#allocation5]  }
   0xf   :  { %s40_s9 = sshll.u32 %s1523_s8, 4  ;;  %s41_s9 = int_to_ptr.vmem [resolvable:$true] %s40_s9 }
  0x10   :  { %s1482_s10 = scalar_lea.vmem %s41_s9, 1024  ;;  %p1487_p6 = scmp.lt.s32.totalorder %s41_s9, %s41_s9 }
  0x11   :  { %p1483_p5 = scmp.ne.s32.totalorder %s41_s9, %s1482_s10  ;;  %p1488_p7 = scmp.lt.s32.totalorder %s1482_s10, %s1482_s10 }
  0x13   :  { %p1489_p8 = por %p1488_p7, %p1487_p6 }
  0x15   :  { %p1490_p9 = pnand %p1489_p8, %p1483_p5 }
  0x17   :  { %1493 = shalt.err (!%p1490_p9)
}
  0x18   :  { %46 = dma.hbm_to_vmem [thread:$0]  %s1707_s5, 1024, %s41_s9, [#allocation6], %s1521_s27, %s1521_s27, %s1522_s28  }
  0x19   :  { %1514 = dma.done.wait [#allocation3], 7168  }
  0x1a   :  { %1515 = vsyncadd [#allocation3], 4294960128 }
  0x1b   :  { %1516 = dma.done.wait [#allocation6], 1024  }
  0x1c   :  { %1517 = vsyncadd [#allocation6], 4294966272  ;;  %v1524_v0 = vmov 0   ;;  %v1525_v1 = vmov 2   ;;  %v1526_v2 = vmov 0.0   ;;  %v56_v3 = vld [vmem:[%s1702_s0] sm:$0xff] }
  0x1d   :  { %1369 = vset.pattern.permute.xlu0 %v1524_v0  ;;  %1371 = vset.pattern.permute.xlu1 %v1525_v1  ;;  %v1374_v4 = vld [vmem:[#allocation2 + $0x38] sm:$0xff]   ;;  %v1375_v5 = vld [vmem:[#allocation2 + $0x30] sm:$0xff]   ;;  %v1527_v6 = vmov 1   ;;  %v1528_v7 = vmov 3   ;;  %v1376_v8 = vld [vmem:[#allocation2 + $0x28] sm:$0xff]   ;;  %vm1529_vm0 = vmmov 0  }
  0x1e   :  { %1198 = vmatprep.subr.bf16.mxu0 %v1526_v2  ;;  %1218 = vmatprep.subr.bf16.mxu1 %v1526_v2  ;;  %v1377_v9 = vld [vmem:[#allocation2 + $0x20] sm:$0xff]   ;;  %v1378_v10 = vld [vmem:[#allocation2 + $0x18] sm:$0xff]   ;;  %v1379_v11 = vld [vmem:[#allocation2 + $0x10] sm:$0xff]   ;;  %s1530_s3 = smov [#allocation7]   ;;  %vm1025_vm1 = vcmask 64512  }
  0x1f   :  { %60 = vperm.xlu0 %1369, %v56_v3   ;;  %81 = vperm.xlu1 %1371, %v56_v3   ;;  %v1380_v12 = vld [vmem:[#allocation2 + $0x8] sm:$0xff]   ;;  %v1381_v13 = vld [vmem:[#allocation2] sm:$0xff]   ;;  %v1382_v14 = vld [vmem:[#allocation2 + $0x78] sm:$0xff]   ;;  %s1033_s13 = sshll.u32 %s1530_s3, 4  ;;  %s1034_s13 = int_to_ptr.vmem [resolvable:$true] %s1033_s13 }
  0x20   :  { %1199 = vmatpush3.bf16.msra.mxu0 %v1374_v4  ;;  %1214 = vmatprep.mubr.msk.bf16.mxu0 %vm1529_vm0, %v1526_v2  ;;  %v1383_v15 = vld [vmem:[#allocation2 + $0x70] sm:$0xff]   ;;  %v1384_v16 = vld [vmem:[#allocation2 + $0x68] sm:$0xff]   ;;  %v1043_v19 = vld [vmem:[%s1703_s1] ss:$0 sm:$0xff]  ;;  %p1499_p11 = scmp.lt.s32.totalorder %s1034_s13, %s1034_s13 }
  0x21   :  { %1200 = vmatprep.subr.bf16.mxu0 %v1526_v2  ;;  %1234 = vmatprep.mubr.msk.bf16.mxu1 %vm1529_vm0, %v1526_v2  ;;  %v1044_v20 = vld [vmem:[%s1703_s1 + $0x1] ss:$0 sm:$0xff]  ;;  %v1045_v21 = vld [vmem:[%s1703_s1 + $0x2] ss:$0 sm:$0xff]  ;;  %v1046_v23 = vld [vmem:[%s1703_s1 + $0x3] ss:$0 sm:$0xff] }
  0x22   :  { %1219 = vmatpush3.bf16.msra.mxu1 %v1382_v14  ;;  %v1047_v31 = vld [vmem:[%s1704_s2] ss:$0 sm:$0xff]  ;;  %v1386_v37 = vld [vmem:[#allocation2 + $0x58] sm:$0xff]   ;;  %v1387_v38 = vld [vmem:[#allocation2 + $0x50] sm:$0xff]  }
  0x23   :  { %1370 = vset.pattern.permute.xlu0 %v1527_v6  ;;  %1372 = vset.pattern.permute.xlu1 %v1528_v7  ;;  %v1385_v36 = vld [vmem:[#allocation2 + $0x60] sm:$0xff]   ;;  %v1388_v39 = vld [vmem:[#allocation2 + $0x48] sm:$0xff]   ;;  %v1390_v41 = vld [vmem:[#allocation2 + $0xb8] sm:$0xff]  }
  0x24   :  { %70 = vperm.xlu0 %1370, %v56_v3   ;;  %92 = vperm.xlu1 %1372, %v56_v3   ;;  %v1389_v40 = vld [vmem:[#allocation2 + $0x40] sm:$0xff]   ;;  %v1391_v42 = vld [vmem:[#allocation2 + $0xb0] sm:$0xff]   ;;  %v1392_v43 = vld [vmem:[#allocation2 + $0xa8] sm:$0xff]  }
  0x25   :  { %1201 = vmatpush3.bf16.msra.mxu0 %v1375_v5  ;;  %1220 = vmatprep.subr.bf16.mxu1 %v1526_v2  ;;  %v1048_v44 = vld [vmem:[%s1706_s4] ss:$0 sm:$0xff]  ;;  %v1394_v53 = vld [vmem:[#allocation2 + $0x98] sm:$0xff]   ;;  %v1395_v54 = vld [vmem:[#allocation2 + $0x90] sm:$0xff]  }
  0x26   :  { %1202 = vmatprep.subr.bf16.mxu0 %v1526_v2  ;;  %1221 = vmatpush3.bf16.msra.mxu1 %v1383_v15  ;;  %v1393_v52 = vld [vmem:[#allocation2 + $0xa0] sm:$0xff]   ;;  %v1396_v55 = vld [vmem:[#allocation2 + $0x88] sm:$0xff]   ;;  %v1398_v57 = vld [vmem:[#allocation2 + $0xf8] sm:$0xff]  }
  0x27   :  { %1222 = vmatprep.subr.bf16.mxu1 %v1526_v2  ;;  %v1397_v56 = vld [vmem:[#allocation2 + $0x80] sm:$0xff]   ;;  %v1399_v58 = vld [vmem:[#allocation2 + $0xf0] sm:$0xff]   ;;  %v1400_v59 = vld [vmem:[#allocation2 + $0xe8] sm:$0xff]  }
  0x28   :  { %1373 = vset.pattern.permute.xlu0 %v1528_v7  ;;  %v1058_v60 = vld [vmem:[%s1706_s4 + $0x1] ss:$0 sm:$0xff]  ;;  %v1402_v6 = vld [vmem:[#allocation2 + $0xd8] sm:$0xff]   ;;  %v1403_v7 = vld [vmem:[#allocation2 + $0xd0] sm:$0xff]  }
  0x29   :  { %1203 = vmatpush3.bf16.msra.mxu0 %v1376_v8  ;;  %v1401_v5 = vld [vmem:[#allocation2 + $0xe0] sm:$0xff]   ;;  %v1404_v8 = vld [vmem:[#allocation2 + $0xc8] sm:$0xff]  }
  0x2a   :  { %1204 = vmatprep.subr.bf16.mxu0 %v1526_v2  ;;  %1223 = vmatpush3.bf16.msra.mxu1 %v1384_v16 }
  0x2b   :  { %1224 = vmatprep.subr.bf16.mxu1 %v1526_v2 }
  0x2d   :  { %1205 = vmatpush3.bf16.msra.mxu0 %v1377_v9  ;;  %v1405_v9 = vld [vmem:[#allocation2 + $0xc0] sm:$0xff]  }
  0x2e   :  { %1206 = vmatprep.subr.bf16.mxu0 %v1526_v2  ;;  %1225 = vmatpush3.bf16.msra.mxu1 %v1385_v36 }
  0x2f   :  { %1226 = vmatprep.subr.bf16.mxu1 %v1526_v2 }
  0x31   :  { %1207 = vmatpush3.bf16.msra.mxu0 %v1378_v10  ;;  %v1406_v10 = vld [vmem:[#allocation2 + $0x138] sm:$0xff]  }
  0x32   :  { %1208 = vmatprep.subr.bf16.mxu0 %v1526_v2  ;;  %1227 = vmatpush3.bf16.msra.mxu1 %v1386_v37  ;;  %v1417_v37 = vld [vmem:[#allocation2 + $0x160] sm:$0xff]  }
  0x33   :  { %1228 = vmatprep.subr.bf16.mxu1 %v1526_v2 }
  0x35   :  { %1209 = vmatpush3.bf16.msra.mxu0 %v1379_v11  ;;  %v1407_v11 = vld [vmem:[#allocation2 + $0x130] sm:$0xff]  }
  0x36   :  { %1210 = vmatprep.subr.bf16.mxu0 %v1526_v2  ;;  %1229 = vmatpush3.bf16.msra.mxu1 %v1387_v38  ;;  %v1418_v38 = vld [vmem:[#allocation2 + $0x158] sm:$0xff]  }
  0x37   :  { %1230 = vmatprep.subr.bf16.mxu1 %v1526_v2 }
  0x39   :  { %1211 = vmatpush3.bf16.msra.mxu0 %v1380_v12  ;;  %v1408_v12 = vld [vmem:[#allocation2 + $0x128] sm:$0xff]  }
  0x3a   :  { %1212 = vmatprep.subr.bf16.mxu0 %v1526_v2  ;;  %1231 = vmatpush3.bf16.msra.mxu1 %v1388_v39  ;;  %v1419_v39 = vld [vmem:[#allocation2 + $0x150] sm:$0xff]  }
  0x3b   :  { %1232 = vmatprep.subr.bf16.mxu1 %v1526_v2 }
  0x3d   :  { %1213 = vmatpush3.bf16.msra.mxu0 %v1381_v13  ;;  %v1068_v13 = vld [vmem:[%s1706_s4 + $0x2] ss:$0 sm:$0xff] }
  0x3e   :  { %1238 = vmatprep.subr.bf16.mxu0 %v1526_v2  ;;  %1233 = vmatpush3.bf16.msra.mxu1 %v1389_v40  ;;  %v1420_v40 = vld [vmem:[#allocation2 + $0x148] sm:$0xff]  }
  0x3f   :  { %1258 = vmatprep.subr.bf16.mxu1 %v1526_v2 }
  0x9a   :  { %v61_v17 = vpop.permute.xlu0 %60  ;;  %v82_v18 = vpop.permute.xlu1 %81 }
  0x9b   :  { %v67_v25 = vmul.f32 %v1043_v19, %v61_v17  ;;  %v88_v27 = vmul.f32 %v1045_v21, %v82_v18  ;;  %v1409_v21 = vld [vmem:[#allocation2 + $0x120] sm:$0xff]  }
  0x9f   :  { %v71_v22 = vpop.permute.xlu0 %70  ;;  %v93_v24 = vpop.permute.xlu1 %92 }
  0xa0   :  { %v77_v26 = vmul.f32 %v1044_v20, %v71_v22  ;;  %v99_v29 = vmul.f32 %v1046_v23, %v93_v24  ;;  %v1410_v22 = vld [vmem:[#allocation2 + $0x118] sm:$0xff]   ;;  %v1411_v23 = vld [vmem:[#allocation2 + $0x110] sm:$0xff]   ;;  %v1412_v24 = vld [vmem:[#allocation2 + $0x108] sm:$0xff]  }
  0xa2   :  { %v78_v28 = vadd.f32 %v77_v26, %v67_v25  ;;  %v1413_v25 = vld [vmem:[#allocation2 + $0x100] sm:$0xff]   ;;  %v1414_v26 = vld [vmem:[#allocation2 + $0x178] sm:$0xff]  }
  0xa4   :  { %v89_v30 = vadd.f32 %v88_v27, %v78_v28  ;;  %v1415_v27 = vld [vmem:[#allocation2 + $0x170] sm:$0xff]   ;;  %v1416_v28 = vld [vmem:[#allocation2 + $0x168] sm:$0xff]  }
  0xa6   :  { %v100_v32 = vadd.f32 %v99_v29, %v89_v30  ;;  %v1078_v29 = vld [vmem:[%s1706_s4 + $0x3] ss:$0 sm:$0xff] }
  0xa8   :  { %v108_v33 = vadd.f32 %v1047_v31, %v100_v32 }
  0xaa   :  { %1438 = vtanh.f32 %v108_v33 }
  0xb7   :  { %v1439_v34 = vpop.eup %1438 }
  0xb8   :  { %v110_v35 = vpack.c.bf16 %v1439_v34, %v1439_v34 }
  0xba   :  { %1215 = vmatmul.mubr.bf16.vlgmr.msra.gmra.mxu0 %v110_v35 }
  0xbb   :  { %1254 = vmatprep.mubr.msk.bf16.mxu0 %vm1529_vm0, %v1526_v2  ;;  %1239 = vmatpush3.bf16.msra.mxu0 %v1390_v41  ;;  %v1421_v41 = vld [vmem:[#allocation2 + $0x140] sm:$0xff]  }
  0xbc   :  { %1240 = vmatprep.subr.bf16.mxu0 %v1526_v2 }
  0xbf   :  { %1241 = vmatpush3.bf16.msra.mxu0 %v1391_v42  ;;  %v1422_v42 = vld [vmem:[#allocation2 + $0x1b8] sm:$0xff]  }
  0xc0   :  { %1242 = vmatprep.subr.bf16.mxu0 %v1526_v2 }
  0xc3   :  { %1243 = vmatpush3.bf16.msra.mxu0 %v1392_v43  ;;  %v1423_v43 = vld [vmem:[#allocation2 + $0x1b0] sm:$0xff]  }
  0xc4   :  { %1244 = vmatprep.subr.bf16.mxu0 %v1526_v2 }
  0xc7   :  { %1245 = vmatpush3.bf16.msra.mxu0 %v1393_v52 }
  0xc8   :  { %1246 = vmatprep.subr.bf16.mxu0 %v1526_v2 }
  0xcb   :  { %1247 = vmatpush3.bf16.msra.mxu0 %v1394_v53  ;;  %v1425_v53 = vld [vmem:[#allocation2 + $0x1a0] sm:$0xff]  }
  0xcc   :  { %1248 = vmatprep.subr.bf16.mxu0 %v1526_v2 }
  0xcf   :  { %1249 = vmatpush3.bf16.msra.mxu0 %v1395_v54  ;;  %v1426_v54 = vld [vmem:[#allocation2 + $0x198] sm:$0xff]  }
  0xd0   :  { %1250 = vmatprep.subr.bf16.mxu0 %v1526_v2 }
  0xd3   :  { %1251 = vmatpush3.bf16.msra.mxu0 %v1396_v55  ;;  %v1427_v55 = vld [vmem:[#allocation2 + $0x190] sm:$0xff]  }
  0xd4   :  { %1252 = vmatprep.subr.bf16.mxu0 %v1526_v2 }
  0xd7   :  { %1253 = vmatpush3.bf16.msra.mxu0 %v1397_v56  ;;  %v1428_v56 = vld [vmem:[#allocation2 + $0x188] sm:$0xff]  }
  0xd8   :  { %1278 = vmatprep.subr.bf16.mxu0 %v1526_v2 }
 0x17a   :  { %v216_v45 = vpop.f32.mrf.mxu0 }
 0x17b   :  { %v217_v46 = vadd.f32 %v1048_v44, %v216_v45  ;;  %v1424_v44 = vld [vmem:[#allocation2 + $0x1a8] sm:$0xff]   ;;  %v1088_v45 = vld [vmem:[%s1706_s4 + $0x4] ss:$0 sm:$0xff] }
 0x17c   :  { %v1216_v47 = vpop.f32.mrf.mxu0 }
 0x17d   :  { %1440 = vtanh.f32 %v217_v46 }
 0x17e   :  { %v219_v48 = vpop.f32.mrf.mxu0 }
 0x180   :  { %v1217_v49 = vpop.f32.mrf.mxu0 }
 0x18a   :  { %v1441_v50 = vpop.eup %1440 }
 0x18b   :  { %v223_v51 = vpack.c.bf16 %v1441_v50, %v1441_v50 }
 0x18d   :  { %1235 = vmatmul.mubr.bf16.vlgmr.msra.gmra.mxu1 %v223_v51 }
 0x18e   :  { %1274 = vmatprep.mubr.msk.bf16.mxu1 %vm1529_vm0, %v1526_v2  ;;  %1259 = vmatpush3.bf16.msra.mxu1 %v1398_v57  ;;  %v1429_v57 = vld [vmem:[#allocation2 + $0x180] sm:$0xff]  }
 0x18f   :  { %1260 = vmatprep.subr.bf16.mxu1 %v1526_v2 }
 0x192   :  { %1261 = vmatpush3.bf16.msra.mxu1 %v1399_v58  ;;  %v1430_v58 = vld [vmem:[#allocation5 + $0x38] sm:$0xff]  }
 0x193   :  { %1262 = vmatprep.subr.bf16.mxu1 %v1526_v2 }
 0x196   :  { %1263 = vmatpush3.bf16.msra.mxu1 %v1400_v59  ;;  %v1431_v59 = vld [vmem:[#allocation5 + $0x30] sm:$0xff]  }
 0x197   :  { %1264 = vmatprep.subr.bf16.mxu1 %v1526_v2 }
 0x19a   :  { %1265 = vmatpush3.bf16.msra.mxu1 %v1401_v5 }
 0x19b   :  { %1266 = vmatprep.subr.bf16.mxu1 %v1526_v2 }
 0x19e   :  { %1267 = vmatpush3.bf16.msra.mxu1 %v1402_v6  ;;  %v1433_v6 = vld [vmem:[#allocation5 + $0x20] sm:$0xff]  }
 0x19f   :  { %1268 = vmatprep.subr.bf16.mxu1 %v1526_v2 }
 0x1a2   :  { %1269 = vmatpush3.bf16.msra.mxu1 %v1403_v7  ;;  %v1434_v7 = vld [vmem:[#allocation5 + $0x18] sm:$0xff]  }
 0x1a3   :  { %1270 = vmatprep.subr.bf16.mxu1 %v1526_v2 }
 0x1a6   :  { %1271 = vmatpush3.bf16.msra.mxu1 %v1404_v8  ;;  %v1435_v8 = vld [vmem:[#allocation5 + $0x10] sm:$0xff]  }
 0x1a7   :  { %1272 = vmatprep.subr.bf16.mxu1 %v1526_v2 }
 0x1aa   :  { %1273 = vmatpush3.bf16.msra.mxu1 %v1405_v9  ;;  %v1436_v9 = vld [vmem:[#allocation5 + $0x8] sm:$0xff]  }
 0x1ab   :  { %1298 = vmatprep.subr.bf16.mxu1 %v1526_v2 }
 0x24d   :  { %v331_v61 = vpop.f32.mrf.mxu1 }
 0x24e   :  { %v332_v62 = vadd.f32 %v1058_v60, %v331_v61  ;;  %v1432_v60 = vld [vmem:[#allocation5 + $0x28] sm:$0xff]   ;;  %v1098_v61 = vld [vmem:[%s1706_s4 + $0x5] ss:$0 sm:$0xff] }
 0x24f   :  { %v1236_v63 = vpop.f32.mrf.mxu1 }
 0x250   :  { %1442 = vtanh.f32 %v332_v62 }
 0x251   :  { %v334_v0 = vpop.f32.mrf.mxu1 }
 0x253   :  { %v1237_v1 = vpop.f32.mrf.mxu1 }
 0x25d   :  { %v1443_v3 = vpop.eup %1442 }
 0x25e   :  { %v338_v4 = vpack.c.bf16 %v1443_v3, %v1443_v3 }
 0x260   :  { %1255 = vmatmul.mubr.bf16.vlgmr.msra.gmra.mxu0 %v338_v4 }
 0x261   :  { %1294 = vmatprep.mubr.msk.bf16.mxu0 %vm1529_vm0, %v1526_v2  ;;  %1279 = vmatpush3.bf16.msra.mxu0 %v1406_v10  ;;  %v1437_v10 = vld [vmem:[#allocation5] sm:$0xff]  }
 0x262   :  { %1280 = vmatprep.subr.bf16.mxu0 %v1526_v2 }
 0x265   :  { %1281 = vmatpush3.bf16.msra.mxu0 %v1407_v11  ;;  %v1108_v11 = vld [vmem:[%s1706_s4 + $0x6] ss:$0 sm:$0xff]  ;;  %s1494_s4 = scalar_lea.vmem %s1034_s13, 128 }
 0x266   :  { %1282 = vmatprep.subr.bf16.mxu0 %v1526_v2  ;;  %p1495_p10 = scmp.ne.s32.totalorder %s1034_s13, %s1494_s4  ;;  %p1500_p12 = scmp.lt.s32.totalorder %s1494_s4, %s1494_s4 }
 0x268   :  { %p1501_p13 = por %p1500_p12, %p1499_p11 }
 0x269   :  { %1283 = vmatpush3.bf16.msra.mxu0 %v1408_v12 }
 0x26a   :  { %1284 = vmatprep.subr.bf16.mxu0 %v1526_v2  ;;  %p1502_p0 = pnand %p1501_p13, %p1495_p10 }
 0x26d   :  { %1285 = vmatpush3.bf16.msra.mxu0 %v1409_v21 }
 0x26e   :  { %1286 = vmatprep.subr.bf16.mxu0 %v1526_v2 }
 0x271   :  { %1287 = vmatpush3.bf16.msra.mxu0 %v1410_v22 }
 0x272   :  { %1288 = vmatprep.subr.bf16.mxu0 %v1526_v2 }
 0x275   :  { %1289 = vmatpush3.bf16.msra.mxu0 %v1411_v23 }
 0x276   :  { %1290 = vmatprep.subr.bf16.mxu0 %v1526_v2 }
 0x279   :  { %1291 = vmatpush3.bf16.msra.mxu0 %v1412_v24 }
 0x27a   :  { %1292 = vmatprep.subr.bf16.mxu0 %v1526_v2 }
 0x27d   :  { %1293 = vmatpush3.bf16.msra.mxu0 %v1413_v25 }
 0x27e   :  { %1318 = vmatprep.subr.bf16.mxu0 %v1526_v2 }
 0x320   :  { %v446_v14 = vpop.f32.mrf.mxu0 }
 0x321   :  { %v447_v15 = vadd.f32 %v1068_v13, %v446_v14 }
 0x322   :  { %v1256_v16 = vpop.f32.mrf.mxu0 }
 0x323   :  { %1444 = vtanh.f32 %v447_v15 }
 0x324   :  { %v449_v17 = vpop.f32.mrf.mxu0 }
 0x326   :  { %v1257_v18 = vpop.f32.mrf.mxu0 }
 0x330   :  { %v1445_v19 = vpop.eup %1444 }
 0x331   :  { %v453_v20 = vpack.c.bf16 %v1445_v19, %v1445_v19  ;;  %v1117_v19 = vld [vmem:[%s1708_s6] ss:$0 sm:$0xff] }
 0x333   :  { %1275 = vmatmul.mubr.bf16.vlgmr.msra.gmra.mxu1 %v453_v20 }
 0x334   :  { %1314 = vmatprep.mubr.msk.bf16.mxu1 %vm1529_vm0, %v1526_v2  ;;  %1299 = vmatpush3.bf16.msra.mxu1 %v1414_v26 }
 0x335   :  { %1300 = vmatprep.subr.bf16.mxu1 %v1526_v2 }
 0x338   :  { %1301 = vmatpush3.bf16.msra.mxu1 %v1415_v27 }
 0x339   :  { %1302 = vmatprep.subr.bf16.mxu1 %v1526_v2 }
 0x33c   :  { %1303 = vmatpush3.bf16.msra.mxu1 %v1416_v28 }
 0x33d   :  { %1304 = vmatprep.subr.bf16.mxu1 %v1526_v2 }
 0x340   :  { %1305 = vmatpush3.bf16.msra.mxu1 %v1417_v37 }
 0x341   :  { %1306 = vmatprep.subr.bf16.mxu1 %v1526_v2 }
 0x344   :  { %1307 = vmatpush3.bf16.msra.mxu1 %v1418_v38 }
 0x345   :  { %1308 = vmatprep.subr.bf16.mxu1 %v1526_v2 }
 0x348   :  { %1309 = vmatpush3.bf16.msra.mxu1 %v1419_v39 }
 0x349   :  { %1310 = vmatprep.subr.bf16.mxu1 %v1526_v2 }
 0x34c   :  { %1311 = vmatpush3.bf16.msra.mxu1 %v1420_v40 }
 0x34d   :  { %1312 = vmatprep.subr.bf16.mxu1 %v1526_v2 }
 0x350   :  { %1313 = vmatpush3.bf16.msra.mxu1 %v1421_v41 }
 0x351   :  { %1338 = vmatprep.subr.bf16.mxu1 %v1526_v2 }
 0x3f3   :  { %v561_v30 = vpop.f32.mrf.mxu1 }
 0x3f4   :  { %v562_v31 = vadd.f32 %v1078_v29, %v561_v30 }
 0x3f5   :  { %v1276_v32 = vpop.f32.mrf.mxu1 }
 0x3f6   :  { %1446 = vtanh.f32 %v562_v31 }
 0x3f7   :  { %v564_v33 = vpop.f32.mrf.mxu1 }
 0x3f9   :  { %v1277_v34 = vpop.f32.mrf.mxu1 }
 0x403   :  { %v1447_v35 = vpop.eup %1446 }
 0x404   :  { %v568_v36 = vpack.c.bf16 %v1447_v35, %v1447_v35 }
 0x406   :  { %1295 = vmatmul.mubr.bf16.vlgmr.msra.gmra.mxu0 %v568_v36 }
 0x407   :  { %1334 = vmatprep.mubr.msk.bf16.mxu0 %vm1529_vm0, %v1526_v2  ;;  %1319 = vmatpush3.bf16.msra.mxu0 %v1422_v42 }
 0x408   :  { %1320 = vmatprep.subr.bf16.mxu0 %v1526_v2 }
 0x40b   :  { %1321 = vmatpush3.bf16.msra.mxu0 %v1423_v43 }
 0x40c   :  { %1322 = vmatprep.subr.bf16.mxu0 %v1526_v2 }
 0x40f   :  { %1323 = vmatpush3.bf16.msra.mxu0 %v1424_v44 }
 0x410   :  { %1324 = vmatprep.subr.bf16.mxu0 %v1526_v2 }
 0x413   :  { %1325 = vmatpush3.bf16.msra.mxu0 %v1425_v53 }
 0x414   :  { %1326 = vmatprep.subr.bf16.mxu0 %v1526_v2 }
 0x417   :  { %1327 = vmatpush3.bf16.msra.mxu0 %v1426_v54 }
 0x418   :  { %1328 = vmatprep.subr.bf16.mxu0 %v1526_v2 }
 0x41b   :  { %1329 = vmatpush3.bf16.msra.mxu0 %v1427_v55 }
 0x41c   :  { %1330 = vmatprep.subr.bf16.mxu0 %v1526_v2 }
 0x41f   :  { %1331 = vmatpush3.bf16.msra.mxu0 %v1428_v56 }
 0x420   :  { %1332 = vmatprep.subr.bf16.mxu0 %v1526_v2 }
 0x423   :  { %1333 = vmatpush3.bf16.msra.mxu0 %v1429_v57 }
 0x4c6   :  { %v676_v46 = vpop.f32.mrf.mxu0 }
 0x4c7   :  { %v677_v47 = vadd.f32 %v1088_v45, %v676_v46 }
 0x4c8   :  { %v1296_v48 = vpop.f32.mrf.mxu0 }
 0x4c9   :  { %1448 = vtanh.f32 %v677_v47 }
 0x4ca   :  { %v679_v49 = vpop.f32.mrf.mxu0 }
 0x4cc   :  { %v1297_v50 = vpop.f32.mrf.mxu0 }
 0x4d6   :  { %v1449_v51 = vpop.eup %1448 }
 0x4d7   :  { %v683_v52 = vpack.c.bf16 %v1449_v51, %v1449_v51 }
 0x4d9   :  { %1315 = vmatmul.mubr.bf16.vlgmr.msra.gmra.mxu1 %v683_v52 }
 0x4da   :  { %1354 = vmatprep.mubr.msk.bf16.mxu1 %vm1529_vm0, %v1526_v2  ;;  %1339 = vmatpush3.bf16.msra.mxu1 %v1430_v58 }
 0x4db   :  { %1340 = vmatprep.subr.bf16.mxu1 %v1526_v2 }
 0x4de   :  { %1341 = vmatpush3.bf16.msra.mxu1 %v1431_v59 }
 0x4df   :  { %1342 = vmatprep.subr.bf16.mxu1 %v1526_v2 }
 0x4e2   :  { %1343 = vmatpush3.bf16.msra.mxu1 %v1432_v60 }
 0x4e3   :  { %1344 = vmatprep.subr.bf16.mxu1 %v1526_v2 }
 0x4e6   :  { %1345 = vmatpush3.bf16.msra.mxu1 %v1433_v6 }
 0x4e7   :  { %1346 = vmatprep.subr.bf16.mxu1 %v1526_v2 }
 0x4ea   :  { %1347 = vmatpush3.bf16.msra.mxu1 %v1434_v7 }
 0x4eb   :  { %1348 = vmatprep.subr.bf16.mxu1 %v1526_v2 }
 0x4ee   :  { %1349 = vmatpush3.bf16.msra.mxu1 %v1435_v8 }
 0x4ef   :  { %1350 = vmatprep.subr.bf16.mxu1 %v1526_v2 }
 0x4f2   :  { %1351 = vmatpush3.bf16.msra.mxu1 %v1436_v9 }
 0x4f3   :  { %1352 = vmatprep.subr.bf16.mxu1 %v1526_v2 }
 0x4f6   :  { %1353 = vmatpush3.bf16.msra.mxu1 %v1437_v10 }
 0x599   :  { %v791_v62 = vpop.f32.mrf.mxu1 }
 0x59a   :  { %v792_v63 = vadd.f32 %v1098_v61, %v791_v62 }
 0x59b   :  { %v1316_v0 = vpop.f32.mrf.mxu1 }
 0x59c   :  { %1450 = vtanh.f32 %v792_v63 }
 0x59d   :  { %v794_v1 = vpop.f32.mrf.mxu1 }
 0x59f   :  { %v1317_v3 = vpop.f32.mrf.mxu1 }
 0x5a9   :  { %v1451_v4 = vpop.eup %1450 }
 0x5aa   :  { %v798_v5 = vpack.c.bf16 %v1451_v4, %v1451_v4 }
 0x5ac   :  { %1335 = vmatmul.mubr.bf16.vlgmr.msra.gmra.mxu0 %v798_v5 }
 0x66c   :  { %v906_v12 = vpop.f32.mrf.mxu0 }
 0x66d   :  { %v907_v13 = vadd.f32 %v1108_v11, %v906_v12 }
 0x66e   :  { %v1336_v14 = vpop.f32.mrf.mxu0 }
 0x66f   :  { %1452 = vtanh.f32 %v907_v13 }
 0x670   :  { %v909_v15 = vpop.f32.mrf.mxu0 }
 0x672   :  { %v1337_v16 = vpop.f32.mrf.mxu0 }
 0x67c   :  { %v1453_v17 = vpop.eup %1452 }
 0x67d   :  { %v913_v18 = vpack.c.bf16 %v1453_v17, %v1453_v17 }
 0x67f   :  { %1355 = vmatmul.mubr.bf16.vlgmr.msra.gmra.mxu1 %v913_v18 }
 0x73f   :  { %v1019_v2 = vpop.f32.mrf.mxu1 }
 0x740   :  { %v1020_v20 = vadd.f32 %v1117_v19, %v1019_v2 }
 0x741   :  { %v1356_v21 = vpop.f32.mrf.mxu1 }
 0x742   :  { %1026 = vst.msk [vmem:[#allocation7] sm:$0xff] %vm1025_vm1, %v1020_v20 }
 0x743   :  { %v1022_v22 = vpop.f32.mrf.mxu1 }
 0x744   :  { %1505 = shalt.err (!%p1502_p0)
}
 0x745   :  { %1036 = dma.vmem_to_hbm [thread:$0]  %s1034_s13, 128, %s1709_s7, [#allocation4]   ;;  %v1357_v23 = vpop.f32.mrf.mxu1 }
 0x746   :  { %1518 = dma.done.wait [#allocation4], 128  }
 0x747   :  { %1519 = vsyncadd [#allocation4], 4294967168 }
 0x748   :  { %1040 = vsyncpa [#allocation3], 1 }
 0x749   :  { %1041 = vsyncpa [#allocation6], 1 }
 0x74a   :  { %1042 = vsyncpa [#allocation4], 1 }

</bundles_post_ra>
